<compile_context>
chip_gen: v5e
topology: v5e:2x2
jax: 0.10.0
libtpu: 0.0.40
codegen_flags: <defaults>
</compile_context>

<pallas_src>
import functools
import math

import jax
import jax.numpy as jnp
from jax import lax
from jax.experimental import pallas as pl
from jax.experimental.pallas import tpu as pltpu


_MAX_IMGS_PER_TILE = 16   # bounds the unrolled per-image border fix-ups


def _vmem_budget_bytes():
    """Scoped-VMEM budget derived from the chip (conservative if unknown)."""
    cap = 64 * 1024 * 1024                     # smallest across v5e/v6e/v7x
    try:
        info = pltpu.get_tpu_info()
        cap = int(getattr(info, "vmem_capacity_bytes", cap) or cap)
    except Exception:
        pass
    return int(min(cap * 3 // 4, 96 * 1024 * 1024))


def _choose_tiling(N, H, W, max_tile_rows=None):
    """Pick (halo, TH): TH rows of the flat (N*H, W) stack per grid step.

    halo=False: TH is a whole number of images (k*H); every image border lies
                inside the tile and is fixed up there.
    halo=True : TH divides H (intra-image row tiling); the two tile-edge rows
                are fixed up from 1-row halos fetched as tiny 8-row slabs.
    """
    NH = N * H
    budget = _vmem_budget_bytes()
    # Keep the compute tile ~1/24 of the budget: ~7 f32 tile-sized live
    # temporaries plus 2x double-buffered in/out still leave >2x headroom.
    tile_target = max(budget // 24, 256 * 1024)
    rows_target = max(8, tile_target // (4 * W))
    if max_tile_rows is not None:
        rows_target = max(8, min(rows_target, int(max_tile_rows)))

    if H <= rows_target:
        # Batch k whole images per tile (biggest win for typical CV sizes).
        k_cap = min(N, max(1, rows_target // H), _MAX_IMGS_PER_TILE)
        m8 = 8 // math.gcd(H, 8)               # k*H must be a multiple of 8
        k = (k_cap // m8) * m8
        if k == 0:
            # TODO(synk): unaligned H near the VMEM target; accept a modest
            # overshoot (<= 8 images) to keep the block 8-row aligned.
            k = min(N, m8)
        return False, k * H

    # Large image: halo'd intra-image row tiles.
    hi = rows_target - rows_target % 8
    for cand in range(hi, 7, -8):
        if H % cand == 0:
            return True, cand
    # TODO(synk): no 8-aligned divisor of H (e.g. huge prime H); fall back to
    # whole image(s) per tile.
    if N == 1 or H % 8 == 0:
        return False, H
    return False, min(N, 8 // math.gcd(H, 8)) * H


def _sobel_kernel(x_ref, *rest, TH, W, H, halo):
    """One (TH, W) row tile of the flattened (N*H, W) image stack."""
    if halo:
        top_ref, bot_ref, o_ref = rest
    else:
        (o_ref,) = rest

    x = x_ref[...].astype(jnp.float32)                     # (TH, W)

    # Lane-boundary masks, built once as (1, W) and broadcast over sublanes.
    col = lax.broadcasted_iota(jnp.int32, (1, W), 1)
    col_first = col == 0
    col_last = col == W - 1

    def hpass(v):
        # dx[i,j] = v[i,j-1] - v[i,j+1] ; sy[i,j] = v[i,j-1] + 2 v[i,j] + v[i,j+1]
        vl = jnp.where(col_first, 0.0, pltpu.roll(v, shift=1, axis=1))
        vr = jnp.where(col_last, 0.0, pltpu.roll(v, shift=W - 1, axis=1))
        return vl - vr, (vl + vr) + 2.0 * v

    dx, sy = hpass(x)

    # Vertical pass with unmasked sublane wrap rolls; rows whose vertical
    # neighbour crosses an image/tile border are recomputed below.
    dx_up = pltpu.roll(dx, shift=1, axis=0)        # dx[i-1]  (row 0 wrong)
    dx_dn = pltpu.roll(dx, shift=TH - 1, axis=0)   # dx[i+1]  (row TH-1 wrong)
    sy_up = pltpu.roll(sy, shift=1, axis=0)
    sy_dn = pltpu.roll(sy, shift=TH - 1, axis=0)

    edge_x = dx_up + 2.0 * dx + dx_dn
    edge_y = sy_up - sy_dn
    o_ref[...] = (jnp.abs(edge_x) + jnp.abs(edge_y)).astype(o_ref.dtype)

    if halo:
        # Intra-image row tiling: tile-edge neighbours come from the 1-row
        # halos (zeroed when the tile edge is a true image border).
        t = pl.program_id(0)
        tiles_per_img = H // TH
        top_scale = jnp.where(t % tiles_per_img == 0, 0.0, 1.0)
        bot_scale = jnp.where((t + 1) % tiles_per_img == 0, 0.0, 1.0)
        tdx, tsy = hpass(top_ref[7:8, :].astype(jnp.float32))
        bdx, bsy = hpass(bot_ref[0:1, :].astype(jnp.float32))
        fixups = [
            (0, top_scale * tdx, top_scale * tsy, dx[1:2, :], sy[1:2, :]),
            (TH - 1, dx[TH - 2:TH - 1, :], sy[TH - 2:TH - 1, :],
             bot_scale * bdx, bot_scale * bsy),
        ]
    else:
        # The tile holds TH // H whole images; the out-of-image vertical
        # neighbour at every image border is exactly zero (Conv2d zero pad).
        zrow = jnp.zeros((1, W), jnp.float32)
        fixups = []
        for m in range(TH // H):
            top, bot = m * H, m * H + H - 1
            if H == 1:
                fixups.append((top, zrow, zrow, zrow, zrow))
            else:
                fixups.append((top, zrow, zrow,
                               dx[top + 1:top + 2, :], sy[top + 1:top + 2, :]))
                fixups.append((bot, dx[bot - 1:bot, :], sy[bot - 1:bot, :],
                               zrow, zrow))

    for r, up_dx, up_sy, dn_dx, dn_sy in fixups:
        ex = up_dx + 2.0 * dx[r:r + 1, :] + dn_dx
        ey = up_sy - dn_sy
        o_ref[r:r + 1, :] = (jnp.abs(ex) + jnp.abs(ey)).astype(o_ref.dtype)


@functools.partial(jax.jit, static_argnames=("max_tile_rows",))
def sobel2d(x_nchw, max_tile_rows=None):
    """x: (N, 1, H, W) -> (N, 1, H, W), matching Sobel2D.forward."""
    N, C, H, W = x_nchw.shape
    if C != 1:
        raise ValueError("Sobel2D operates on single-channel images (C == 1)")

    if x_nchw.dtype not in (jnp.float32, jnp.bfloat16):
        # TODO(synk): other float dtypes are upcast to f32 at the boundary.
        x_nchw = x_nchw.astype(jnp.float32)
    x2 = x_nchw.reshape(N * H, W)             # free, row-major reshape

    halo, TH = _choose_tiling(N, H, W, max_tile_rows)
    NH = N * H
    grid = (pl.cdiv(NH, TH),)

    kernel = functools.partial(_sobel_kernel, TH=TH, W=W, H=H, halo=halo)
    out_shape = jax.ShapeDtypeStruct((NH, W), x2.dtype)
    cparams = pltpu.CompilerParams(
        dimension_semantics=("parallel",),     # megacore sharding of the tiles
        vmem_limit_bytes=_vmem_budget_bytes())

    def tile_spec():
        return pl.BlockSpec((TH, W), lambda t: (t, 0))

    if halo:
        step = TH // 8
        nblk8 = NH // 8
        in_specs = [
            tile_spec(),
            # 8-row slabs whose last / first row is the 1-row halo above /
            # below the tile (clamped at the stack ends; zeroed in-kernel at
            # true image borders).  ~16/TH extra HBM traffic.
            pl.BlockSpec((8, W), lambda t: (jnp.maximum(t * step - 1, 0), 0)),
            pl.BlockSpec((8, W),
                         lambda t: (jnp.minimum((t + 1) * step, nblk8 - 1), 0)),
        ]
        operands = (x2, x2, x2)
    else:
        in_specs = [tile_spec()]
        operands = (x2,)

    out = pl.pallas_call(
        kernel,
        out_shape=out_shape,
        grid=grid,
        in_specs=in_specs,
        out_specs=tile_spec(),
        compiler_params=cparams,
    )(*operands)
    return out.reshape(N, 1, H, W)


# ----------------------------------------------------------------------------
# Pure-JAX reference (validation only)
# ----------------------------------------------------------------------------
def _ref_sobel(x_nchw):
    kx = jnp.array([[1., 0., -1.], [2., 0., -2.], [1., 0., -1.]],
                   jnp.float32).reshape(1, 1, 3, 3)
    ky = jnp.array([[1., 2., 1.], [0., 0., 0.], [-1., -2., -1.]],
                   jnp.float32).reshape(1, 1, 3, 3)
    dn = ("NCHW", "OIHW", "NCHW")
    conv = lambda a, w: lax.conv_general_dilated(
        a.astype(jnp.float32), w, (1, 1), ((1, 1), (1, 1)),
        dimension_numbers=dn)
    return jnp.abs(conv(x_nchw, kx)) + jnp.abs(conv(x_nchw, ky))


if __name__ == "__main__":
    # 1) Baseline small shape (multi-image-per-tile path): (2, 1, 16, 16) f32.
    x = jax.random.normal(jax.random.PRNGKey(0), (2, 1, 16, 16), jnp.float32)
    out = jax.block_until_ready(sobel2d(x))
    assert out.shape == x.shape and out.dtype == x.dtype
    err = float(jnp.max(jnp.abs(out - _ref_sobel(x))))
    assert err < 1e-3, f"f32 mismatch vs reference: {err}"

    # 2) Halo'd intra-image row-tiling path (forced small tile height).
    xh = jax.random.normal(jax.random.PRNGKey(1), (1, 1, 32, 128), jnp.float32)
    outh = jax.block_until_ready(sobel2d(xh, max_tile_rows=8))
    errh = float(jnp.max(jnp.abs(outh - _ref_sobel(xh))))
    assert errh < 1e-3, f"halo-path mismatch vs reference: {errh}"

    # 3) bf16 I/O path (HBM bytes halved; math stays f32 in-kernel).
    xb = jax.random.normal(jax.random.PRNGKey(2), (2, 1, 16, 128),
                           jnp.float32).astype(jnp.bfloat16)
    outb = jax.block_until_ready(sobel2d(xb))
    assert outb.dtype == jnp.bfloat16
    refb = _ref_sobel(xb).astype(jnp.bfloat16)
    errb = float(jnp.max(jnp.abs(outb.astype(jnp.float32) -
                                 refb.astype(jnp.float32))))
    assert errb < 0.25, f"bf16 mismatch vs reference: {errb}"

    print("KERNEL_OK")
</pallas_src>

<mosaic_0001>
module attributes {stable_mosaic.version = 11 : i64} {
  func.func @_sobel_kernel(%arg0: i32, %arg1: memref<32x16xf32, #tpu.memory_space<vmem>>, %arg2: memref<32x16xf32, #tpu.memory_space<vmem>>) attributes {dimension_semantics = [#tpu.dimension_semantics<parallel>], iteration_bounds = array<i64: 1>, scalar_prefetch = 0 : i64, scratch_operands = 0 : i64, tpu.core_type = #tpu.core_type<tc>, window_params = [{transform_indices = @transform_0, window_bounds = array<i64: 32, 16>}, {transform_indices = @transform_1, window_bounds = array<i64: 32, 16>}]} {
    %c0 = arith.constant 0 : index
    %c0_0 = arith.constant 0 : index
    %0 = vector.load %arg1[%c0, %c0_0] : memref<32x16xf32, #tpu.memory_space<vmem>>, vector<32x16xf32>
    %1 = tpu.iota {dimensions = array<i32: 1>} : vector<1x16xi32>
    %c0_i32 = arith.constant 0 : i32
    %2 = vector.broadcast %c0_i32 : i32 to vector<1x16xi32>
    %3 = arith.cmpi eq, %1, %2 : vector<1x16xi32>
    %c15_i32 = arith.constant 15 : i32
    %4 = vector.broadcast %c15_i32 : i32 to vector<1x16xi32>
    %5 = arith.cmpi eq, %1, %4 : vector<1x16xi32>
    %c1_i32 = arith.constant 1 : i32
    %6 = tpu.dynamic_rotate %0 by %c1_i32 dim 1 : vector<32x16xf32>, i32 -> vector<32x16xf32>
    %cst = arith.constant 0.000000e+00 : f32
    %7 = vector.shape_cast %3 : vector<1x16xi1> to vector<1x16xi1>
    %8 = vector.broadcast %7 : vector<1x16xi1> to vector<32x16xi1>
    %9 = vector.broadcast %cst : f32 to vector<32x16xf32>
    %10 = arith.select %8, %9, %6 : vector<32x16xi1>, vector<32x16xf32>
    %c15_i32_1 = arith.constant 15 : i32
    %11 = tpu.dynamic_rotate %0 by %c15_i32_1 dim 1 : vector<32x16xf32>, i32 -> vector<32x16xf32>
    %cst_2 = arith.constant 0.000000e+00 : f32
    %12 = vector.shape_cast %5 : vector<1x16xi1> to vector<1x16xi1>
    %13 = vector.broadcast %12 : vector<1x16xi1> to vector<32x16xi1>
    %14 = vector.broadcast %cst_2 : f32 to vector<32x16xf32>
    %15 = arith.select %13, %14, %11 : vector<32x16xi1>, vector<32x16xf32>
    %16 = arith.subf %10, %15 : vector<32x16xf32>
    %17 = arith.addf %10, %15 : vector<32x16xf32>
    %cst_3 = arith.constant 2.000000e+00 : f32
    %18 = vector.broadcast %cst_3 : f32 to vector<32x16xf32>
    %19 = arith.mulf %18, %0 : vector<32x16xf32>
    %20 = arith.addf %17, %19 : vector<32x16xf32>
    %c1_i32_4 = arith.constant 1 : i32
    %21 = tpu.dynamic_rotate %16 by %c1_i32_4 dim 0 : vector<32x16xf32>, i32 -> vector<32x16xf32>
    %c31_i32 = arith.constant 31 : i32
    %22 = tpu.dynamic_rotate %16 by %c31_i32 dim 0 : vector<32x16xf32>, i32 -> vector<32x16xf32>
    %c1_i32_5 = arith.constant 1 : i32
    %23 = tpu.dynamic_rotate %20 by %c1_i32_5 dim 0 : vector<32x16xf32>, i32 -> vector<32x16xf32>
    %c31_i32_6 = arith.constant 31 : i32
    %24 = tpu.dynamic_rotate %20 by %c31_i32_6 dim 0 : vector<32x16xf32>, i32 -> vector<32x16xf32>
    %cst_7 = arith.constant 2.000000e+00 : f32
    %25 = vector.broadcast %cst_7 : f32 to vector<32x16xf32>
    %26 = arith.mulf %25, %16 : vector<32x16xf32>
    %27 = arith.addf %21, %26 : vector<32x16xf32>
    %28 = arith.addf %27, %22 : vector<32x16xf32>
    %29 = arith.subf %23, %24 : vector<32x16xf32>
    %30 = math.absf %28 : vector<32x16xf32>
    %31 = math.absf %29 : vector<32x16xf32>
    %32 = arith.addf %30, %31 : vector<32x16xf32>
    %c0_8 = arith.constant 0 : index
    %c0_9 = arith.constant 0 : index
    %33 = vector.load %arg2[%c0_8, %c0_9] : memref<32x16xf32, #tpu.memory_space<vmem>>, vector<32x16xf32>
    tpu.vector_store %arg2[%c0_8, %c0_9], %32 {strides = array<i32>} : memref<32x16xf32, #tpu.memory_space<vmem>>, vector<32x16xf32>,
    %cst_10 = arith.constant 0.000000e+00 : f32
    %34 = vector.broadcast %cst_10 : f32 to vector<1x16xf32>
    %35 = vector.extract_strided_slice %16 {offsets = [1, 0], sizes = [1, 16], strides = [1, 1]} : vector<32x16xf32> to vector<1x16xf32>
    %36 = vector.extract_strided_slice %20 {offsets = [1, 0], sizes = [1, 16], strides = [1, 1]} : vector<32x16xf32> to vector<1x16xf32>
    %37 = vector.extract_strided_slice %16 {offsets = [14, 0], sizes = [1, 16], strides = [1, 1]} : vector<32x16xf32> to vector<1x16xf32>
    %38 = vector.extract_strided_slice %20 {offsets = [14, 0], sizes = [1, 16], strides = [1, 1]} : vector<32x16xf32> to vector<1x16xf32>
    %39 = vector.extract_strided_slice %16 {offsets = [17, 0], sizes = [1, 16], strides = [1, 1]} : vector<32x16xf32> to vector<1x16xf32>
    %40 = vector.extract_strided_slice %20 {offsets = [17, 0], sizes = [1, 16], strides = [1, 1]} : vector<32x16xf32> to vector<1x16xf32>
    %41 = vector.extract_strided_slice %16 {offsets = [30, 0], sizes = [1, 16], strides = [1, 1]} : vector<32x16xf32> to vector<1x16xf32>
    %42 = vector.extract_strided_slice %20 {offsets = [30, 0], sizes = [1, 16], strides = [1, 1]} : vector<32x16xf32> to vector<1x16xf32>
    %43 = vector.extract_strided_slice %16 {offsets = [0, 0], sizes = [1, 16], strides = [1, 1]} : vector<32x16xf32> to vector<1x16xf32>
    %cst_11 = arith.constant 2.000000e+00 : f32
    %44 = vector.broadcast %cst_11 : f32 to vector<1x16xf32>
    %45 = arith.mulf %44, %43 : vector<1x16xf32>
    %46 = arith.addf %34, %45 : vector<1x16xf32>
    %47 = arith.addf %46, %35 : vector<1x16xf32>
    %48 = arith.subf %34, %36 : vector<1x16xf32>
    %49 = math.absf %47 : vector<1x16xf32>
    %50 = math.absf %48 : vector<1x16xf32>
    %51 = arith.addf %49, %50 : vector<1x16xf32>
    %c0_12 = arith.constant 0 : index
    %c0_13 = arith.constant 0 : index
    %52 = vector.load %arg2[%c0_12, %c0_13] : memref<32x16xf32, #tpu.memory_space<vmem>>, vector<1x16xf32>
    tpu.vector_store %arg2[%c0_12, %c0_13], %51 {strides = array<i32>} : memref<32x16xf32, #tpu.memory_space<vmem>>, vector<1x16xf32>,
    %53 = vector.extract_strided_slice %16 {offsets = [15, 0], sizes = [1, 16], strides = [1, 1]} : vector<32x16xf32> to vector<1x16xf32>
    %cst_14 = arith.constant 2.000000e+00 : f32
    %54 = vector.broadcast %cst_14 : f32 to vector<1x16xf32>
    %55 = arith.mulf %54, %53 : vector<1x16xf32>
    %56 = arith.addf %37, %55 : vector<1x16xf32>
    %57 = arith.addf %56, %34 : vector<1x16xf32>
    %58 = arith.subf %38, %34 : vector<1x16xf32>
    %59 = math.absf %57 : vector<1x16xf32>
    %60 = math.absf %58 : vector<1x16xf32>
    %61 = arith.addf %59, %60 : vector<1x16xf32>
    %c15 = arith.constant 15 : index
    %c0_15 = arith.constant 0 : index
    %62 = vector.load %arg2[%c15, %c0_15] : memref<32x16xf32, #tpu.memory_space<vmem>>, vector<1x16xf32>
    tpu.vector_store %arg2[%c15, %c0_15], %61 {strides = array<i32>} : memref<32x16xf32, #tpu.memory_space<vmem>>, vector<1x16xf32>,
    %63 = vector.extract_strided_slice %16 {offsets = [16, 0], sizes = [1, 16], strides = [1, 1]} : vector<32x16xf32> to vector<1x16xf32>
    %cst_16 = arith.constant 2.000000e+00 : f32
    %64 = vector.broadcast %cst_16 : f32 to vector<1x16xf32>
    %65 = arith.mulf %64, %63 : vector<1x16xf32>
    %66 = arith.addf %34, %65 : vector<1x16xf32>
    %67 = arith.addf %66, %39 : vector<1x16xf32>
    %68 = arith.subf %34, %40 : vector<1x16xf32>
    %69 = math.absf %67 : vector<1x16xf32>
    %70 = math.absf %68 : vector<1x16xf32>
    %71 = arith.addf %69, %70 : vector<1x16xf32>
    %c16 = arith.constant 16 : index
    %c0_17 = arith.constant 0 : index
    %72 = vector.load %arg2[%c16, %c0_17] : memref<32x16xf32, #tpu.memory_space<vmem>>, vector<1x16xf32>
    tpu.vector_store %arg2[%c16, %c0_17], %71 {strides = array<i32>} : memref<32x16xf32, #tpu.memory_space<vmem>>, vector<1x16xf32>,
    %73 = vector.extract_strided_slice %16 {offsets = [31, 0], sizes = [1, 16], strides = [1, 1]} : vector<32x16xf32> to vector<1x16xf32>
    %cst_18 = arith.constant 2.000000e+00 : f32
    %74 = vector.broadcast %cst_18 : f32 to vector<1x16xf32>
    %75 = arith.mulf %74, %73 : vector<1x16xf32>
    %76 = arith.addf %41, %75 : vector<1x16xf32>
    %77 = arith.addf %76, %34 : vector<1x16xf32>
    %78 = arith.subf %42, %34 : vector<1x16xf32>
    %79 = math.absf %77 : vector<1x16xf32>
    %80 = math.absf %78 : vector<1x16xf32>
    %81 = arith.addf %79, %80 : vector<1x16xf32>
    %c31 = arith.constant 31 : index
    %c0_19 = arith.constant 0 : index
    %82 = vector.load %arg2[%c31, %c0_19] : memref<32x16xf32, #tpu.memory_space<vmem>>, vector<1x16xf32>
    tpu.vector_store %arg2[%c31, %c0_19], %81 {strides = array<i32>} : memref<32x16xf32, #tpu.memory_space<vmem>>, vector<1x16xf32>,
    return
  }
  func.func @transform_0(%arg0: i32) -> (i32, i32) {
    %c0_i32 = arith.constant 0 : i32
    %c0_i32_0 = arith.constant 0 : i32
    return %arg0, %c0_i32 : i32, i32
  }
  func.func @transform_1(%arg0: i32) -> (i32, i32) {
    %c0_i32 = arith.constant 0 : i32
    %c0_i32_0 = arith.constant 0 : i32
    return %arg0, %c0_i32 : i32, i32
  }
}

</mosaic_0001>

<bundles_post_ra>
// kernel: sobel2d.1
= control target key start
LH: loop header
LB: loop body
LE: loop exit
PB: predicated region body
PF: predicated region fallthrough
CT: control target
= control target key end

     0   :  { %6 = vsyncpa [#allocation3], 0  ;;  %s441_s0 = inlined_call_operand.hbm [shape: f32[32,16], index: 0, kind: input, shape index: {}]   ;;  %s442_s1 = inlined_call_operand.hbm [shape: f32[32,16], index: 1, kind: output, shape index: {}]  }
   0x1   :  { %7 = vsyncpa [#allocation4], 0  ;;  %s12_s8 = sshll.u32 %s441_s0, 4  ;;  %s307_s9 = smov [#allocation2]   ;;  %s13_s8 = int_to_ptr.hbm [resolvable:$true] %s12_s8 }
   0x2   :  { %s14_s10 = sshll.u32 %s307_s9, 4  ;;  %s308_s11 = smov 128   ;;  %s15_s10 = int_to_ptr.vmem [resolvable:$true] %s14_s10 }
   0x3   :  { %s309_s12 = smov 8  }
   0x4   :  { %20 = dma.hbm_to_vmem [thread:$0]  %s13_s8, 512, %s15_s10, [#allocation3], %s308_s11, %s308_s11, %s309_s12  }
   0x5   :  { %303 = dma.done.wait [#allocation3], 512  }
   0x6   :  { %304 = vsyncadd [#allocation3], 4294966784  ;;  %v27_v0 = vld [vmem:[#allocation2 + $0x10] sm:$0xff]  ;;  %v25_v1 = vld [vmem:[#allocation2] sm:$0xff]  ;;  %s310_s13 = smov 16   ;;  %vm33_vm0 = vcmask 1047680   ;;  %v29_v21 = vlaneseq }
   0x7   :  { %40 = vrot.lane.b32.xlu1 %v27_v0, %s310_s13  ;;  %34 = vrot.lane.b32.xlu0 %v25_v1, %s310_s13  ;;  %v330_v2 = vld [vmem:[#allocation2 + $0x18] sm:$0xff]  ;;  %v26_v3 = vld [vmem:[#allocation2 + $0x8] sm:$0xff]  ;;  %s311_s0 = smov 113   ;;  %s312_s14 = smov 127   ;;  %v106_v28 = vmul.f32 2.0, %v25_v1  ;;  %v108_v32 = vmul.f32 2.0, %v27_v0 }
   0x8   :  { %v30_v23 = vand.u32 127, %v29_v21  ;;  %v350_v38 = vshrl.u32 %v29_v21, 7  ;;  %v107_v45 = vmul.f32 2.0, %v26_v3  ;;  %v109_v46 = vmul.f32 2.0, %v330_v2  ;;  %s313_s15 = smov [#allocation5]   ;;  %s235_s19 = sshll.u32 %s442_s1, 4  ;;  %s236_s19 = int_to_ptr.hbm [resolvable:$true] %s235_s19 }
   0x9   :  { %vm178_vm5 = vcmask 130048   ;;  %vm205_vm6 = vcmask 129030   ;;  %vm195_vm7 = vcmask 122880   ;;  %s233_s16 = sshll.u32 %s313_s15, 4  ;;  %s234_s16 = int_to_ptr.vmem [resolvable:$true] %s233_s16 }
   0xa   :  { %vm31_vm1 = vcmp.eq.s32.totalorder %v30_v23, 0  ;;  %vm32_vm2 = vcmp.eq.s32.totalorder %v30_v23, 15  ;;  %vm120_vm3 = vcmp.lt.s32.totalorder %v350_v38, 1  ;;  %vm129_vm4 = vcmp.lt.s32.totalorder %v350_v38, 7 }
   0xf   :  { %43 = vrot.lane.b32.xlu1 %v330_v2, %s310_s13  ;;  %37 = vrot.lane.b32.xlu0 %v26_v3, %s310_s13 }
  0x79   :  { %v41_v4 = vpop.permute.xlu1 %40  ;;  %v35_v5 = vpop.permute.xlu0 %34 }
  0x7a   :  { %v42_v6 = vsel %vm33_vm0, %v41_v4, %v27_v0  ;;  %v36_v7 = vsel %vm33_vm0, %v35_v5, %v25_v1 }
  0x7b   :  { %50 = vrot.lane.b32.xlu0 %v42_v6, %s310_s13  ;;  %46 = vrot.lane.b32.xlu2 %v36_v7, %s310_s13 }
  0x81   :  { %v44_v8 = vpop.permute.xlu1 %43  ;;  %v38_v9 = vpop.permute.xlu0 %37 }
  0x82   :  { %v45_v10 = vsel %vm33_vm0, %v44_v8, %v330_v2  ;;  %v39_v11 = vsel %vm33_vm0, %v38_v9, %v26_v3 }
  0x83   :  { %52 = vrot.lane.b32.xlu1 %v45_v10, %s310_s13  ;;  %48 = vrot.lane.b32.xlu2 %v39_v11, %s310_s13 }
  0xd5   :  { %v47_v12 = vpop.permute.xlu2 %46 }
  0xd6   :  { %v54_v13 = vsel %vm33_vm0, %v47_v12, %v25_v1 }
  0xd7   :  { %64 = vrot.lane.b32.xlu2 %v54_v13, %s311_s0 }
  0xdd   :  { %v49_v14 = vpop.permute.xlu2 %48 }
  0xde   :  { %v55_v15 = vsel %vm33_vm0, %v49_v14, %v26_v3 }
  0xdf   :  { %66 = vrot.lane.b32.xlu0 %v55_v15, %s311_s0 }
  0xe7   :  { %82 = vrot.lane.b32.xlu0 %v54_v13, %s312_s14 }
  0xed   :  { %v51_v16 = vpop.permute.xlu0 %50 }
  0xee   :  { %v56_v17 = vsel %vm33_vm0, %v51_v16, %v27_v0 }
  0xef   :  { %68 = vrot.lane.b32.xlu1 %v56_v17, %s311_s0 }
  0xf5   :  { %v53_v18 = vpop.permute.xlu1 %52 }
  0xf6   :  { %v57_v19 = vsel %vm33_vm0, %v53_v18, %v330_v2 }
  0xf7   :  { %70 = vrot.lane.b32.xlu2 %v57_v19, %s311_s0  ;;  %88 = vrot.lane.b32.xlu0 %v57_v19, %s312_s14 }
  0xf8   :  { %84 = vrot.lane.b32.xlu1 %v55_v15, %s312_s14 }
  0xff   :  { %86 = vrot.lane.b32.xlu2 %v56_v17, %s312_s14 }
 0x131   :  { %v65_v20 = vpop.permute.xlu2 %64 }
 0x132   :  { %v76_v26 = vsel %vm31_vm1, 0.0, %v65_v20 }
 0x151   :  { %v67_v22 = vpop.permute.xlu0 %66  ;;  %v71_v24 = vpop.permute.xlu2 %70 }
 0x152   :  { %v79_v47 = vsel %vm31_vm1, 0.0, %v71_v24  ;;  %v77_v48 = vsel %vm31_vm1, 0.0, %v67_v22 }
 0x159   :  { %v83_v25 = vpop.permute.xlu0 %82  ;;  %v87_v31 = vpop.permute.xlu2 %86 }
 0x15a   :  { %v94_v27 = vsel %vm32_vm2, 0.0, %v83_v25  ;;  %v96_v34 = vsel %vm32_vm2, 0.0, %v87_v31 }
 0x15b   :  { %v102_v29 = vadd.f32 %v94_v27, %v76_v26  ;;  %v98_v35 = vsub.f32 %v76_v26, %v94_v27 }
 0x15d   :  { %v345_v30 = vadd.f32 %v106_v28, %v102_v29  ;;  %v125_v42 = vrot.slane %v98_v35, 1  ;;  %v354_v43 = vmul.f32 2.0, %v98_v35  ;;  %v114_v51 = vrot.slane %v98_v35, 7 }
 0x15f   :  { %v188_v36 = vsub.f32 0.0, %v345_v30  ;;  %v134_v52 = vrot.slane %v345_v30, 7  ;;  %v142_v53 = vrot.slane %v345_v30, 1  ;;  %v367_v56 = vadd.f32 %v354_v43, %v125_v42 }
 0x161   :  { %v69_v33 = vpop.permute.xlu1 %68  ;;  %v356_v44 = vand.u32 2147483647, %v188_v36 }
 0x162   :  { %v78_v37 = vsel %vm31_vm1, 0.0, %v69_v33 }
 0x163   :  { %v104_v39 = vadd.f32 %v96_v34, %v78_v37  ;;  %v100_v40 = vsub.f32 %v78_v37, %v96_v34  ;;  %v192_v57 = vrot.slane %v356_v44, 1 }
 0x165   :  { %v352_v41 = vadd.f32 %v108_v32, %v104_v39  ;;  %v127_v49 = vrot.slane %v100_v40, 1  ;;  %v152_v50 = vmul.f32 2.0, %v100_v40  ;;  %v116_v58 = vrot.slane %v100_v40, 7 }
 0x167   :  { %v212_v54 = vsub.f32 0.0, %v352_v41  ;;  %v136_v61 = vrot.slane %v352_v41, 7  ;;  %v144_v1 = vrot.slane %v352_v41, 1  ;;  %v376_v2 = vadd.f32 %v152_v50, %v127_v49 }
 0x169   :  { %v89_v55 = vpop.permute.xlu0 %88  ;;  %v378_v5 = vand.u32 2147483647, %v212_v54 }
 0x16a   :  { %v85_v59 = vpop.permute.xlu1 %84  ;;  %v97_v60 = vsel %vm32_vm2, 0.0, %v89_v55 }
 0x16b   :  { %v95_v62 = vsel %vm32_vm2, 0.0, %v85_v59  ;;  %v373_v63 = vsub.f32 %v79_v47, %v97_v60  ;;  %v105_v0 = vadd.f32 %v97_v60, %v79_v47 }
 0x16c   :  { %v99_v3 = vsub.f32 %v77_v48, %v95_v62  ;;  %v103_v4 = vadd.f32 %v95_v62, %v77_v48 }
 0x16d   :  { %v380_v6 = vadd.f32 %v109_v46, %v105_v0  ;;  %v117_v7 = vrot.slane %v373_v63, 7  ;;  %v128_v8 = vrot.slane %v373_v63, 1  ;;  %v153_v41 = vmul.f32 2.0, %v373_v63 }
 0x16e   :  { %v111_v9 = vadd.f32 %v107_v45, %v103_v4  ;;  %v115_v10 = vrot.slane %v99_v3, 7  ;;  %v126_v11 = vrot.slane %v99_v3, 1  ;;  %v151_v12 = vmul.f32 2.0, %v99_v3 }
 0x16f   :  { %v121_v13 = vsel %vm120_vm3, %v116_v58, %v117_v7  ;;  %v124_v14 = vsel %vm120_vm3, %v117_v7, %v114_v51  ;;  %v130_v15 = vsel %vm129_vm4, %v127_v49, %v128_v8  ;;  %v133_v16 = vsel %vm129_vm4, %v128_v8, %v125_v42 }
 0x170   :  { %v122_v17 = vsel %vm120_vm3, %v115_v10, %v116_v58  ;;  %v123_v18 = vsel %vm120_vm3, %v114_v51, %v115_v10  ;;  %v131_v19 = vsel %vm129_vm4, %v126_v11, %v127_v49  ;;  %v132_v20 = vsel %vm129_vm4, %v125_v42, %v126_v11 }
 0x171   :  { %v135_v21 = vrot.slane %v111_v9, 7  ;;  %v143_v22 = vrot.slane %v111_v9, 1  ;;  %v155_v23 = vadd.f32 %v151_v12, %v123_v18  ;;  %v156_v24 = vadd.f32 %v152_v50, %v122_v17 }
 0x172   :  { %v198_v25 = vrot.slane %v151_v12, 1  ;;  %v203_v26 = vand.u32 2147483647, %v111_v9  ;;  %v137_v27 = vrot.slane %v380_v6, 7  ;;  %v145_v28 = vrot.slane %v380_v6, 1 }
 0x173   :  { %v139_v29 = vsel %vm120_vm3, %v135_v21, %v136_v61  ;;  %v140_v30 = vsel %vm120_vm3, %v134_v52, %v135_v21  ;;  %v147_v31 = vsel %vm129_vm4, %v143_v22, %v144_v1  ;;  %v148_v32 = vsel %vm129_vm4, %v142_v53, %v143_v22 }
 0x174   :  { %v159_v33 = vadd.f32 %v155_v23, %v131_v19  ;;  %v163_v34 = vsub.f32 %v140_v30, %v147_v31  ;;  %v200_v35 = vadd.f32 %v198_v25, %v99_v3  ;;  %v138_v36 = vsel %vm120_vm3, %v136_v61, %v137_v27 }
 0x175   :  { %v141_v37 = vsel %vm120_vm3, %v137_v27, %v134_v52  ;;  %v146_v39 = vsel %vm129_vm4, %v144_v1, %v145_v28  ;;  %v149_v40 = vsel %vm129_vm4, %v145_v28, %v142_v53  ;;  %v154_v47 = vadd.f32 %v354_v43, %v124_v14 }
 0x176   :  { %v167_v42 = vand.u32 2147483647, %v159_v33  ;;  %v171_v45 = vand.u32 2147483647, %v163_v34  ;;  %v202_v46 = vand.u32 2147483647, %v200_v35  ;;  %v157_v48 = vadd.f32 %v153_v41, %v121_v13 }
 0x177   :  { %v160_v49 = vadd.f32 %v156_v24, %v130_v15  ;;  %v162_v50 = vsub.f32 %v141_v37, %v148_v32  ;;  %v164_v51 = vsub.f32 %v139_v29, %v146_v39  ;;  %v158_v52 = vadd.f32 %v154_v47, %v132_v20 }
 0x178   :  { %v175_v54 = vadd.f32 %v171_v45, %v167_v42  ;;  %v204_v55 = vadd.f32 %v203_v26, %v202_v46  ;;  %v165_v58 = vsub.f32 %v138_v36, %v149_v40  ;;  %v161_v59 = vadd.f32 %v157_v48, %v133_v16 }
 0x179   :  { %v168_v60 = vand.u32 2147483647, %v160_v49  ;;  %v170_v61 = vand.u32 2147483647, %v162_v50  ;;  %v172_v38 = vand.u32 2147483647, %v164_v51 }
 0x17a   :  { %180 = vst.msk [vmem:[#allocation5 + $0x8] sm:$0xff] %vm178_vm5, %v175_v54  ;;  %v166_v53 = vand.u32 2147483647, %v158_v52  ;;  %v173_v62 = vand.u32 2147483647, %v165_v58  ;;  %v221_v0 = vrot.slane %v153_v41, 1 }
 0x17b   :  { %v216_v1 = vrot.slane %v378_v5, 1  ;;  %206 = vst.msk [vmem:[#allocation5 + $0x9] sm:$0x40] %vm205_vm6, %v204_v55  ;;  %v169_v43 = vand.u32 2147483647, %v161_v59  ;;  %v176_v3 = vadd.f32 %v172_v38, %v168_v60 }
 0x17c   :  { %v189_v4 = vand.u32 2147483647, %v367_v56  ;;  %v174_v7 = vadd.f32 %v170_v61, %v166_v53  ;;  %v223_v8 = vadd.f32 %v221_v0, %v373_v63  ;;  %v213_v9 = vand.u32 2147483647, %v376_v2 }
 0x17d   :  { %v177_v10 = vadd.f32 %v173_v62, %v169_v43  ;;  %181 = vst.msk [vmem:[#allocation5 + $0x10] sm:$0xff] %vm178_vm5, %v176_v3  ;;  %v226_v63 = vand.u32 2147483647, %v380_v6 }
 0x17e   :  { %v194_v5 = vadd.f32 %v192_v57, %v189_v4  ;;  %179 = vst.msk [vmem:[#allocation5] sm:$0xff] %vm178_vm5, %v174_v7  ;;  %v225_v56 = vand.u32 2147483647, %v223_v8  ;;  %v218_v11 = vadd.f32 %v216_v1, %v213_v9 }
 0x17f   :  { %182 = vst.msk [vmem:[#allocation5 + $0x18] sm:$0xff] %vm178_vm5, %v177_v10 }
 0x180   :  { %196 = vst.msk [vmem:[#allocation5] sm:$0x1] %vm195_vm7, %v194_v5  ;;  %v227_v2 = vadd.f32 %v226_v63, %v225_v56 }
 0x181   :  { %219 = vst.msk [vmem:[#allocation5 + $0x10] sm:$0x1] %vm195_vm7, %v218_v11 }
 0x182   :  { %228 = vst.msk [vmem:[#allocation5 + $0x19] sm:$0x40] %vm205_vm6, %v227_v2 }
 0x183   :  { %241 = dma.vmem_to_hbm [thread:$0]  %s234_s16, 512, %s236_s19, [#allocation4], %s308_s11, %s308_s11, %s309_s12  }
 0x184   :  { %305 = dma.done.wait [#allocation4], 512  }
 0x185   :  { %306 = vsyncadd [#allocation4], 4294966784 }
 0x186   :  { %246 = vsyncpa [#allocation3], 1 }
 0x187   :  { %247 = vsyncpa [#allocation4], 1 }

</bundles_post_ra>
